<compile_context>
chip_gen: v7x
topology: tpu7x:2x2x1
jax: 0.10.0
libtpu: 0.0.40
codegen_flags: <defaults>
</compile_context>

<pallas_src>
import functools

import jax
import jax.numpy as jnp
from jax import lax
from jax.experimental import pallas as pl
from jax.experimental.pallas import tpu as pltpu


_LANE = 128
_X_BLOCK_BUDGET = 16 * 1024 * 1024   # bytes per x block (2x double-buffered -> 32 MiB)
_MAX_LANES = 16384                   # <= 128 unrolled 128-lane chunk adds per step
_VMEM_LIMIT_CAP = 56 * 1024 * 1024   # safe on v7x (64 MiB/TC) and v5e/v6e (128 MiB)


def _round_down(x, m):
    return x // m * m


def _mean_kernel(x_ref, out_ref, acc_ref, *, hw_total, hw_tile, inv_hw):
    """Accumulate per-channel spatial sums; write the mean on the last step."""
    j = pl.program_id(1)
    last = pl.num_programs(1) - 1

    @pl.when(j == 0)
    def _init():
        acc_ref[...] = jnp.zeros_like(acc_ref)

    if hw_tile % _LANE != 0:
        # Single small block covering the full (hw < 128) spatial extent.
        acc_ref[...] += jnp.sum(x_ref[...].astype(jnp.float32), axis=-1,
                                keepdims=True)
    else:
        n_chunks = hw_tile // _LANE

        def accumulate(masked):
            valid = hw_total - j * hw_tile
            lane = lax.broadcasted_iota(jnp.int32, (1, _LANE), 1)
            for k in range(n_chunks):
                # Chunk-wise load straight from the ref: no (c, hw_tile) f32 temp.
                chunk = x_ref[:, k * _LANE:(k + 1) * _LANE].astype(jnp.float32)
                if masked:
                    # Zero the stale-VMEM tail of the ragged boundary block.
                    chunk = jnp.where(lane + (k * _LANE) < valid, chunk, 0.0)
                acc_ref[...] += chunk

        if hw_total % hw_tile != 0:
            # Pay for masking only on the last (ragged) spatial step.
            @pl.when(j != last)
            def _steady():
                accumulate(masked=False)

            @pl.when(j == last)
            def _ragged():
                accumulate(masked=True)
        else:
            accumulate(masked=False)

    @pl.when(j == last)
    def _finalize():
        # One cross-lane (XLU) reduce per batch item, then scale to the mean.
        s = jnp.sum(acc_ref[...], axis=-1, keepdims=True) * inv_hw     # (c, 1)
        out_ref[...] = s.astype(out_ref.dtype)


def _choose_hw_tile(hw, c, itemsize):
    if hw < _LANE:
        return hw
    max_lanes = _round_down(_X_BLOCK_BUDGET // max(1, c * itemsize), _LANE)
    max_lanes = int(min(max(max_lanes, _LANE), _MAX_LANES))
    return min(_round_down(hw, _LANE), max_lanes)


def _se_squeeze_pallas(x, *, hw_tile=None):
    """Per-(b, c) spatial mean of NCHW x, accumulated in f32. Returns (b, c) f32."""
    b, c, hgt, wid = x.shape
    hw = hgt * wid
    itemsize = x.dtype.itemsize

    if hw_tile is None:
        hw_tile = _choose_hw_tile(hw, c, itemsize)
    if hw < _LANE:
        hw_tile = hw                      # full-extent block (legal for any size)
    else:
        hw_tile = max(_LANE, min(_round_down(hw_tile, _LANE),
                                 _round_down(hw, _LANE)))
    num_hw = pl.cdiv(hw, hw_tile)
    acc_lanes = _LANE if hw_tile % _LANE == 0 else 1

    x_flat = x.reshape(b, c, hw)

    # Explicit scoped-VMEM limit: 2x double-buffered x blocks + accumulator + slack.
    x_block_bytes = c * hw_tile * itemsize
    acc_bytes = c * acc_lanes * 4
    vmem_limit = int(min(max(2 * x_block_bytes + acc_bytes + (8 << 20), 32 << 20),
                         _VMEM_LIMIT_CAP))

    kernel = functools.partial(
        _mean_kernel, hw_total=hw, hw_tile=hw_tile, inv_hw=1.0 / float(hw))

    cost = pl.CostEstimate(
        flops=b * c * hw,
        transcendentals=0,
        bytes_accessed=b * c * hw * itemsize + b * c * 4)

    out = pl.pallas_call(
        kernel,
        out_shape=jax.ShapeDtypeStruct((b, c, 1), jnp.float32),
        grid_spec=pltpu.PrefetchScalarGridSpec(
            num_scalar_prefetch=0,
            grid=(b, num_hw),
            in_specs=[pl.BlockSpec((None, c, hw_tile), lambda bi, j: (bi, 0, j))],
            out_specs=pl.BlockSpec((None, c, 1), lambda bi, j: (bi, 0, 0)),
            scratch_shapes=[pltpu.VMEM((c, acc_lanes), jnp.float32)],
        ),
        compiler_params=pltpu.CompilerParams(
            dimension_semantics=("parallel", "arbitrary"),
            vmem_limit_bytes=vmem_limit),
        cost_estimate=cost,
    )(x_flat)

    return out[:, :, 0]                    # (b, c) f32


def _excite(means_f32, w1, b1, w2, b2, out_dtype):
    # Batched (M = b) excitation MLP in plain XLA: full MXU row utilization,
    # weights never enter kernel VMEM.
    h = jnp.maximum(means_f32 @ w1.astype(jnp.float32) + b1.astype(jnp.float32), 0.0)
    o = jax.nn.sigmoid(h @ w2.astype(jnp.float32) + b2.astype(jnp.float32))
    return o.astype(out_dtype)


def se_reference(x, w1, b1, w2, b2):
    """Pure-JAX reference matching the PyTorch SE.forward semantics."""
    b, c, _, _ = x.shape
    s = jnp.mean(x.astype(jnp.float32), axis=(2, 3))
    h = jnp.maximum(s @ w1.astype(jnp.float32) + b1.astype(jnp.float32), 0.0)
    o = jax.nn.sigmoid(h @ w2.astype(jnp.float32) + b2.astype(jnp.float32))
    return o.reshape(b, c, 1, 1).astype(x.dtype)


def se_forward(x, w1, b1, w2, b2, *, hw_tile=None, force_pallas=False):
    """x: (b, c, h, w) NCHW. Returns the SE excitation gate, shape (b, c, 1, 1)."""
    b, c, hgt, wid = x.shape
    # Tiny activations: fused XLA beats kernel-launch + per-grid-step overhead.
    if not force_pallas and b * c * hgt * wid * x.dtype.itemsize < (1 << 20):
        return se_reference(x, w1, b1, w2, b2)
    means = _se_squeeze_pallas(x, hw_tile=hw_tile)              # (b, c) f32
    return _excite(means, w1, b1, w2, b2, x.dtype).reshape(b, c, 1, 1)


if __name__ == "__main__":
    key = jax.random.PRNGKey(0)

    def make_params(k, c, r=4):
        hidden = int(c / r)
        kw1, kb1, kw2, kb2 = jax.random.split(k, 4)
        w1 = jax.random.normal(kw1, (c, hidden), jnp.float32) * 0.1
        b1 = jax.random.normal(kb1, (hidden,), jnp.float32) * 0.1
        w2 = jax.random.normal(kw2, (hidden, c), jnp.float32) * 0.1
        b2 = jax.random.normal(kb2, (c,), jnp.float32) * 0.1
        return w1, b1, w2, b2

    k1, k2, k3, k4, kx1, kx2, kx3, kx4 = jax.random.split(key, 8)

    # Case 1: module-consistent small shape (planes=8, r=4); single spatial block.
    B, C, H, W = 2, 8, 16, 16
    w1, b1, w2, b2 = make_params(k1, C)
    x = jax.random.normal(kx1, (B, C, H, W), dtype=jnp.float32)
    out = jax.block_until_ready(se_forward(x, w1, b1, w2, b2, force_pallas=True))
    ref = se_reference(x, w1, b1, w2, b2)
    assert out.shape == (B, C, 1, 1), out.shape
    assert jnp.allclose(out, ref, atol=1e-5, rtol=1e-5), "case 1 mismatch"

    # Case 2: multi-step spatial grid + ragged last block (hw=400, tile=128 -> 4 steps).
    B2, C2, H2, W2 = 2, 16, 20, 20
    w1b, b1b, w2b, b2b = make_params(k2, C2)
    x2 = jax.random.normal(kx2, (B2, C2, H2, W2), dtype=jnp.float32)
    out2 = jax.block_until_ready(
        se_forward(x2, w1b, b1b, w2b, b2b, hw_tile=128, force_pallas=True))
    ref2 = se_reference(x2, w1b, b1b, w2b, b2b)
    assert out2.shape == (B2, C2, 1, 1), out2.shape
    assert jnp.allclose(out2, ref2, atol=1e-5, rtol=1e-5), "case 2 mismatch"

    # Case 3: small spatial extent (7x7 < 128 lanes): full-extent single block path.
    B3, C3, H3, W3 = 2, 32, 7, 7
    w1c, b1c, w2c, b2c = make_params(k3, C3)
    x3 = jax.random.normal(kx3, (B3, C3, H3, W3), dtype=jnp.float32)
    out3 = jax.block_until_ready(se_forward(x3, w1c, b1c, w2c, b2c, force_pallas=True))
    ref3 = se_reference(x3, w1c, b1c, w2c, b2c)
    assert out3.shape == (B3, C3, 1, 1), out3.shape
    assert jnp.allclose(out3, ref3, atol=1e-5, rtol=1e-5), "case 3 mismatch"

    # Case 4: bf16 input exercises the chunk-wise upcast path (native-dtype HBM reads).
    B4, C4, H4, W4 = 2, 16, 32, 32
    w1d, b1d, w2d, b2d = make_params(k4, C4)
    x4 = jax.random.normal(kx4, (B4, C4, H4, W4), dtype=jnp.float32).astype(jnp.bfloat16)
    out4 = jax.block_until_ready(se_forward(x4, w1d, b1d, w2d, b2d, force_pallas=True))
    ref4 = se_reference(x4, w1d, b1d, w2d, b2d)
    assert out4.shape == (B4, C4, 1, 1), out4.shape
    assert jnp.allclose(out4.astype(jnp.float32), ref4.astype(jnp.float32),
                        atol=1e-2, rtol=1e-2), "case 4 mismatch"

    print("KERNEL_OK")
</pallas_src>

<mosaic_0001>
module attributes {stable_mosaic.version = 11 : i64} {
  func.func @_mean_kernel(%arg0: i32, %arg1: i32, %arg2: memref<1x8x256xf32, #tpu.memory_space<vmem>>, %arg3: memref<1x8x1xf32, #tpu.memory_space<vmem>>, %arg4: memref<8x128xf32, #tpu.memory_space<vmem>>) attributes {dimension_semantics = [#tpu.dimension_semantics<parallel>, #tpu.dimension_semantics<arbitrary>], iteration_bounds = array<i64: 2, 1>, scalar_prefetch = 0 : i64, scratch_operands = 1 : i64, tpu.core_type = #tpu.core_type<tc>, window_params = [{transform_indices = @transform_0, window_bounds = array<i64: 1, 8, 256>}, {transform_indices = @transform_1, window_bounds = array<i64: 1, 8, 1>}]} {
    %c0_i32 = arith.constant 0 : i32
    %0 = arith.cmpi eq, %arg1, %c0_i32 : i32
    %1 = arith.extui %0 : i1 to i32
    %c0_i32_0 = arith.constant 0 : i32
    %2 = arith.cmpi ne, %1, %c0_i32_0 : i32
    scf.if %2 {
      %cst = arith.constant 0.000000e+00 : f32
      %16 = vector.broadcast %cst : f32 to vector<8x128xf32>
      %c0_15 = arith.constant 0 : index
      %c0_16 = arith.constant 0 : index
      %17 = vector.load %arg4[%c0_15, %c0_16] : memref<8x128xf32, #tpu.memory_space<vmem>>, vector<8x128xf32>
      tpu.vector_store %arg4[%c0_15, %c0_16], %16 {strides = array<i32>} : memref<8x128xf32, #tpu.memory_space<vmem>>, vector<8x128xf32>,
    } else {
    }
    %c0 = arith.constant 0 : index
    %c0_1 = arith.constant 0 : index
    %c0_2 = arith.constant 0 : index
    %3 = vector.load %arg2[%c0, %c0_1, %c0_2] : memref<1x8x256xf32, #tpu.memory_space<vmem>>, vector<1x8x128xf32>
    %4 = vector.shape_cast %3 : vector<1x8x128xf32> to vector<8x128xf32>
    %c0_3 = arith.constant 0 : index
    %c0_4 = arith.constant 0 : index
    %5 = vector.load %arg4[%c0_3, %c0_4] : memref<8x128xf32, #tpu.memory_space<vmem>>, vector<8x128xf32>
    %6 = arith.addf %5, %4 : vector<8x128xf32>
    %c0_5 = arith.constant 0 : index
    %c0_6 = arith.constant 0 : index
    %7 = vector.load %arg4[%c0_5, %c0_6] : memref<8x128xf32, #tpu.memory_space<vmem>>, vector<8x128xf32>
    tpu.vector_store %arg4[%c0_5, %c0_6], %6 {strides = array<i32>} : memref<8x128xf32, #tpu.memory_space<vmem>>, vector<8x128xf32>,
    %c0_7 = arith.constant 0 : index
    %c0_8 = arith.constant 0 : index
    %c128 = arith.constant 128 : index
    %8 = vector.load %arg2[%c0_7, %c0_8, %c128] : memref<1x8x256xf32, #tpu.memory_space<vmem>>, vector<1x8x128xf32>
    %9 = vector.shape_cast %8 : vector<1x8x128xf32> to vector<8x128xf32>
    %c0_9 = arith.constant 0 : index
    %c0_10 = arith.constant 0 : index
    %10 = vector.load %arg4[%c0_9, %c0_10] : memref<8x128xf32, #tpu.memory_space<vmem>>, vector<8x128xf32>
    %11 = arith.addf %10, %9 : vector<8x128xf32>
    %c0_11 = arith.constant 0 : index
    %c0_12 = arith.constant 0 : index
    %12 = vector.load %arg4[%c0_11, %c0_12] : memref<8x128xf32, #tpu.memory_space<vmem>>, vector<8x128xf32>
    tpu.vector_store %arg4[%c0_11, %c0_12], %11 {strides = array<i32>} : memref<8x128xf32, #tpu.memory_space<vmem>>, vector<8x128xf32>,
    %c0_i32_13 = arith.constant 0 : i32
    %13 = arith.cmpi eq, %arg1, %c0_i32_13 : i32
    %14 = arith.extui %13 : i1 to i32
    %c0_i32_14 = arith.constant 0 : i32
    %15 = arith.cmpi ne, %14, %c0_i32_14 : i32
    scf.if %15 {
      %c0_15 = arith.constant 0 : index
      %c0_16 = arith.constant 0 : index
      %16 = vector.load %arg4[%c0_15, %c0_16] : memref<8x128xf32, #tpu.memory_space<vmem>>, vector<8x128xf32>
      %cst = arith.constant dense<0.000000e+00> : vector<8xf32>
      %17 = vector.multi_reduction <add>, %16, %cst [1] : vector<8x128xf32> to vector<8xf32>
      %18 = vector.shape_cast %17 : vector<8xf32> to vector<8x1xf32>
      %cst_17 = arith.constant 3.906250e-03 : f32
      %19 = vector.broadcast %cst_17 : f32 to vector<8x1xf32>
      %20 = arith.mulf %18, %19 : vector<8x1xf32>
      %c0_18 = arith.constant 0 : index
      %c0_19 = arith.constant 0 : index
      %c0_20 = arith.constant 0 : index
      %21 = vector.load %arg3[%c0_18, %c0_19, %c0_20] : memref<1x8x1xf32, #tpu.memory_space<vmem>>, vector<1x8x1xf32>
      %22 = vector.shape_cast %21 : vector<1x8x1xf32> to vector<8x1xf32>
      %23 = vector.shape_cast %20 : vector<8x1xf32> to vector<1x8x1xf32>
      tpu.vector_store %arg3[%c0_18, %c0_19, %c0_20], %23 {strides = array<i32>} : memref<1x8x1xf32, #tpu.memory_space<vmem>>, vector<1x8x1xf32>,
    } else {
    }
    return
  }
  func.func @transform_0(%arg0: i32, %arg1: i32) -> (i32, i32, i32) {
    %c0_i32 = arith.constant 0 : i32
    %c0_i32_0 = arith.constant 0 : i32
    return %arg0, %c0_i32, %arg1 : i32, i32, i32
  }
  func.func @transform_1(%arg0: i32, %arg1: i32) -> (i32, i32, i32) {
    %c0_i32 = arith.constant 0 : i32
    %c0_i32_0 = arith.constant 0 : i32
    %c0_i32_1 = arith.constant 0 : i32
    return %arg0, %c0_i32, %c0_i32_0 : i32, i32, i32
  }
}

</mosaic_0001>

<bundles_post_ra>
// kernel: tpu_custom_call.1
= control target key start
LH: loop header
LB: loop body
LE: loop exit
PB: predicated region body
PF: predicated region fallthrough
CT: control target
= control target key end

     0   :  { %6 = vsyncpa [#allocation4], 0  ;;  %s534_s0 = inlined_call_operand.hbm [shape: f32[2,8,256], index: 0, kind: input, shape index: {}]   ;;  %s535_s1 = inlined_call_operand.vmem [shape: f32[2,8,1], index: 1, kind: output, shape index: {}]  }
   0x1   :  { %8 = vsyncpa [#allocation4 + $0x1], 0  ;;  %s409_s6 = smov 0   ;;  %s411_s7 = smov 0  }
   0x2   :  { %s413_s8 = smov 0   ;;  %s415_s9 = smov 0  }
   0x3   :  { %s417_s10 = smov 0   ;;  %s419_s11 = smov 0  }
   0x4 LB: > { %s248_s12 = sadd.s32 4294967295, %s396_s11   ;;  %s26_s13 = sadd.s32 1, %s392_s10  ;;  %s396_s11 = sphi %s419_s11, %s14_s11   ;;  %s392_s10 = sphi %s417_s10, %s545_s10   ;;  %s388_s9 = sphi %s415_s9, %s544_s9   ;;  %s384_s8 = sphi %s413_s8, %s543_s8   ;;  %s380_s7 = sphi %s411_s7, %s542_s7   ;;  %s376_s6 = sphi %s409_s6, %s541_s6  }
   0x5   : > { %p28_p0 = scmp.ge.s32.totalorder %s26_s13, 2  ;;  %s35_s14 = sadd.s32 1, %s384_s8 }
   0x6   : > { %p42_p1 = scmp.ne.s32.totalorder %s384_s8, %s380_s7  ;;  %p43_p2 = scmp.eq.s32.totalorder %s396_s11, 0 }
   0x7   : > { %s547_s13 = smov (%p28_p0, %s26_s13), 0  ;;  %p48_p4 = scmp.ne.s32.totalorder %s380_s7, %s376_s6 }
   0x8   : > { %p445_p3 = por %p43_p2, %p42_p1  ;;  %s30_s16 = ssub.s32 %s392_s10, %s547_s13 }
   0x9   : > { %p49_p5 = scmp.eq.s32.totalorder %s248_s12, 0  ;;  %p33_p6 = scmp.eq.s32.totalorder %s30_s16, 0 }
   0xa   : > { %p267_p8 = scmp.lt.s32.totalorder %s396_s11, 2  ;;  %s98_s19 = sand.u32 1, %s384_s8  }
   0xb   : > { %p452_p7 = por %p49_p5, %p48_p4  ;;  %s260_s20 = sshll.u32 %s392_s10, 8 }
   0xc   : > { %s458_s18 = scalar_select %p33_p6, %s384_s8, %s35_s14  }
   0xd   : > { %s252_s21 = sshll.u32 %s98_s19, 4  ;;  %s465_s24 = scalar_lea.hbm %s534_s0, %s260_s20 }
   0xe   : > { %s102_s25 = scalar_lea.vmem [#allocation3], %s252_s21  ;;  %p469_p9 = pnand %p267_p8, %p445_p3 }
   0xf   : > { %s112_s26 = sshll.u32 %s102_s25, 4  ;;  %s99_s28 = scalar_lea.sflag [#allocation4], %s98_s19  ;;  %s473_s26 = int_to_ptr.vmem [resolvable:$true] %s112_s26 }
  0x10   : > { %s316_s29 = scalar_lea.hbm %s465_s24, 256  ;;  %p318_p13 = pneg %p469_p9 }
  0x11   : > { %p317_p12 = scmp.ne.s32.totalorder %s465_s24, %s316_s29  ;;  %s321_s3 = scalar_lea.hbm %s534_s0, 512 }
  0x12   : > { %p322_p2 = scmp.lt.u32.totalorder %s465_s24, %s534_s0  ;;  %p323_p3 = scmp.lt.u32.totalorder %s321_s3, %s316_s29 }
  0x13   : > { %p319_p0 = pnand %p318_p13, %p317_p12  ;;  %p325_p5 = scmp.lt.u32.totalorder %s316_s29, %s465_s24 }
  0x14   : > { %p324_p4 = por %p323_p3, %p322_p2 }
  0x15   : > { %p320_p1 = pneg %p319_p0 }
  0x16   : > { %p326_p6 = por %p325_p5, %p324_p4 }
  0x18   : > { %p327_p8 = pnand %p326_p6, %p320_p1 }
  0x1a   : > { %330 = shalt.err (!%p327_p8)
}
  0x1b   : > { %s331_s6 = scalar_lea.vmem %s473_s26, 256  ;;  %s398_s12 = smov [#allocation3]  }
  0x1c   : > { %p332_p12 = scmp.ne.s32.totalorder %s473_s26, %s331_s6  ;;  %s336_s14 = sshll.u32 %s398_s12, 4  ;;  %s337_s14 = int_to_ptr.vmem [resolvable:$false] %s336_s14 }
  0x1d   : > { %s338_s15 = scalar_lea.vmem %s337_s14, 512  ;;  %p339_p11 = scmp.lt.s32.totalorder %s473_s26, %s337_s14 }
  0x1e   : > { %p334_p0 = pnand %p332_p12, %p318_p13  ;;  %p340_p2 = scmp.lt.s32.totalorder %s338_s15, %s331_s6 }
  0x20   : > { %p335_p10 = pneg %p334_p0  ;;  %p341_p3 = por %p340_p2, %p339_p11 }
  0x22   : > { %p342_p4 = pnand %p341_p3, %p335_p10 }
  0x24   : > { %345 = shalt.err (!%p342_p4)
}
  0x25   : > { %266 = dma.hbm_to_vmem [thread:$0]  (!%p469_p9), %s465_s24, 256, %s473_s26, %s99_s28  }
  0x26   : > { %p539_p1 = scmp.lt.s32.totalorder %s396_s11, 3  ;;  %p540_p5 = scmp.ge.s32.totalorder %s396_s11, 1 }
  0x28   : > { %p118_p13 = pnand %p540_p5, %p539_p1 }
  0x29   : > { %s123_s16 = sand.u32 (!%p118_p13), 1, %s380_s7  }
  0x2a   : > { %121 = sbr.rel (%p118_p13) target bundleno = 198 (0xc6), region = 24  ;;  %s256_s19 = sshll.u32 (!%p118_p13), %s123_s16, 4 }
  0x2b   : > { %s124_s20 = scalar_lea.sflag (!%p118_p13), [#allocation4], %s123_s16  ;;  %s127_s21 = scalar_lea.vmem (!%p118_p13), [#allocation3], %s256_s19 }
  0x31   : > { %371 = dma.done.wait (%p452_p7), %s124_s20, 256  }
  0x32   : > { %373 = vsyncadd (%p452_p7), %s124_s20, 4294967040  ;;  %v155_v0 = vld [vmem:[%s127_s21] sm:$0xff]  ;;  %v159_v1 = vld [vmem:[%s127_s21 + $0x8] sm:$0xff]  ;;  %p146_p9 = scmp.lt.s32.totalorder %s388_s9, 1  ;;  %vm170_vm0 = vcmask 7168  }
  0x33   : > { %v161_v2 = vadd.f32 %v159_v1, %v155_v0 }
  0x34   : > { %s549_s9 = smov (!%p146_p9, %s388_s9), 1 }
  0x35   : > { %167 = vadd.xlane.f32.xlu0 %v161_v2  ;;  %s257_s22 = sshll.u32 %s549_s9, 3 }
  0x36   : > { %s149_s25 = scalar_lea.vmem %s535_s1, %s257_s22 }
  0xc2   : > { %v168_v3 = vpop.xlane.xlu0 %167 }
  0xc3   : > { %v169_v4 = vmul.f32 0.00390625, %v168_v3 }
  0xc5   : > { %171 = vst.msk [vmem:[%s149_s25] sm:$0xff] %vm170_vm0, %v169_v4 }
  0xc6 PF: > { %s14_s11 = sadd.s32 1, %s396_s11   ;;  %s541_s6 = smov %s380_s7 }
  0xc7   : > { %p11_p7 = scmp.ge.s32.totalorder %s14_s11, 4   ;;  %s542_s7 = smov %s384_s8 }
  0xc8   : > { %s543_s8 = smov %s458_s18  ;;  %s544_s9 = smov %s392_s10 }
  0xc9   : > { %s545_s10 = smov %s547_s13  ;;  %13 = sbr.rel (!%p11_p7) target bundleno = 4 (0x4), region = 72 }
  0xd0   :  { %191 = vsyncpa [#allocation4], 1 }
  0xd1   :  { %193 = vsyncpa [#allocation4 + $0x1], 1 }

</bundles_post_ra>
